<compile_context>
chip_gen: v7x
topology: tpu7x:2x2x1
jax: 0.10.0
libtpu: 0.0.40
codegen_flags: <defaults>
</compile_context>

<pallas_src>
import jax
import jax.numpy as jnp
from jax import lax
from jax.experimental import pallas as pl
from jax.experimental.pallas import tpu as pltpu

_EPS = 1e-12  # F.normalize default eps


# ---------------------------------------------------------------------------
# Fused NetVLAD kernel: one grid step == (one branch, Bt batch elements).
#   x_ref  : (Bt, 1, N, D)   frames x features for this (batch tile, branch)
#   c_ref  : (1, D, K)       clusters for this branch (bfloat16)
#   c2_ref : (1, K, D)       clusters2 for this branch, pre-transposed (f32)
#   o_ref  : (Bt, 1, K, D)   normalized VLAD descriptors, lane-dense over D
# ---------------------------------------------------------------------------
def netvlad_kernel(x_ref, c_ref, c2_ref, o_ref):
    Bt, _, N, D = x_ref.shape
    K = c_ref.shape[-1]

    x = x_ref[...].reshape(Bt, N, D)                      # (Bt, N, D) f32

    # F.normalize(x, p=2, dim=-1)  (f32, rsqrt on the EUP)
    ss = jnp.sum(x * x, axis=-1, keepdims=True)
    x = x * lax.rsqrt(jnp.maximum(ss, _EPS * _EPS))
    x_bf = x.astype(jnp.bfloat16)

    # assignment = softmax(x @ clusters, dim=-1)
    # flatten batch into the MXU M dimension: (Bt*N, D) @ (D, K)
    logits = jnp.dot(x_bf.reshape(Bt * N, D), c_ref[0],
                     preferred_element_type=jnp.float32)  # (Bt*N, K) f32
    logits = logits - jnp.max(logits, axis=-1, keepdims=True)
    expv = jnp.exp(logits)
    assign = expv * pl.reciprocal(
        jnp.sum(expv, axis=-1, keepdims=True), approx=True)
    assign = assign.reshape(Bt, N, K)

    # a[b, k, d] = (sum_n assign[b, n, k]) * clusters2[d, k]   (clusters2 given as (K, D))
    a_sum = jnp.sum(assign, axis=1)                       # (Bt, K)
    a = a_sum[:, :, None] * c2_ref[0]                     # (Bt, K, D)

    # vlad[b, k, d] = sum_n assign[b, n, k] * x[b, n, d]  -> lane-dense (K, D)
    vlad = jnp.einsum('bnk,bnd->bkd',
                      assign.astype(jnp.bfloat16), x_bf,
                      preferred_element_type=jnp.float32)  # (Bt, K, D) f32
    vlad = vlad - a

    # intra (per-cluster, over D) and global L2 normalizations, folded into
    # a single scale applied at the store.
    ss_k = jnp.sum(vlad * vlad, axis=-1, keepdims=True)            # (Bt, K, 1)
    r_in = lax.rsqrt(jnp.maximum(ss_k, _EPS * _EPS))               # (Bt, K, 1)
    tot = jnp.sum(ss_k * (r_in * r_in), axis=1, keepdims=True)     # (Bt, 1, 1)
    r_tot = lax.rsqrt(jnp.maximum(tot, _EPS * _EPS))               # (Bt, 1, 1)

    out = vlad * (r_in * r_tot)                                    # (Bt, K, D)
    o_ref[...] = out.reshape(Bt, 1, K, D).astype(o_ref.dtype)


def _pick_batch_tile(B, max_tile=8):
    bt = min(B, max_tile)
    while B % bt:
        bt -= 1
    return bt


def netvlad_fused(x, clusters, clusters2):
    """x: (B, 2, N, D); clusters: (2, D, K); clusters2: (2, K, D) -> (B, 2, K, D)."""
    B, S, N, D = x.shape
    K = clusters.shape[-1]
    Bt = _pick_batch_tile(B)
    return pl.pallas_call(
        netvlad_kernel,
        out_shape=jax.ShapeDtypeStruct((B, S, K, D), jnp.float32),
        grid=(S, B // Bt),
        in_specs=[
            pl.BlockSpec((Bt, 1, N, D), lambda s, bt: (bt, s, 0, 0)),
            pl.BlockSpec((1, D, K), lambda s, bt: (s, 0, 0)),
            pl.BlockSpec((1, K, D), lambda s, bt: (s, 0, 0)),
        ],
        out_specs=pl.BlockSpec((Bt, 1, K, D), lambda s, bt: (bt, s, 0, 0)),
        compiler_params=pltpu.CompilerParams(
            dimension_semantics=("parallel", "parallel")),
    )(x, clusters.astype(jnp.bfloat16), clusters2)


# ---------------------------------------------------------------------------
# fc + sigmoid head, tiled over the F_in contraction with a VMEM accumulator.
#   x_ref: (B, tk)   w_ref: (C, tk) bf16   b_ref: (1, C)   o_ref: (B, C)
# ---------------------------------------------------------------------------
def fc_sigmoid_kernel(x_ref, w_ref, b_ref, o_ref, acc_ref):
    k = pl.program_id(0)

    @pl.when(k == 0)
    def _():
        acc_ref[...] = jnp.zeros_like(acc_ref)

    acc_ref[...] += lax.dot_general(
        x_ref[...].astype(jnp.bfloat16), w_ref[...],
        (((1,), (1,)), ((), ())),
        preferred_element_type=jnp.float32)                # (B, C)

    @pl.when(k == pl.num_programs(0) - 1)
    def _():
        o_ref[...] = jax.nn.sigmoid(acc_ref[...] + b_ref[...])


def fc_sigmoid(x, w, b, *, tile_k=4096):
    """x: (B, F_in); w: (C, F_in) lane-dense; b: (1, C) -> sigmoid(x @ w.T + b)."""
    B, F_in = x.shape
    C = w.shape[0]
    tk = min(F_in, tile_k)
    assert F_in % tk == 0, "F_in must be divisible by the contraction tile"
    return pl.pallas_call(
        fc_sigmoid_kernel,
        out_shape=jax.ShapeDtypeStruct((B, C), jnp.float32),
        grid=(F_in // tk,),
        in_specs=[
            pl.BlockSpec((B, tk), lambda k: (0, k)),
            pl.BlockSpec((C, tk), lambda k: (0, k)),
            pl.BlockSpec((1, C), lambda k: (0, 0)),
        ],
        out_specs=pl.BlockSpec((B, C), lambda k: (0, 0)),
        scratch_shapes=[pltpu.VMEM((B, C), jnp.float32)],
        compiler_params=pltpu.CompilerParams(
            dimension_semantics=("arbitrary",)),
    )(x, w.astype(jnp.bfloat16), b)


# ---------------------------------------------------------------------------
# Model wrapper (glue in plain JAX)
# ---------------------------------------------------------------------------
def init_params(key, feature_size, vocab_size, num_classes):
    cluster_size = vocab_size // 2
    D, K = feature_size, cluster_size
    k0, k1, k2, k3, k4, k5 = jax.random.split(key, 6)
    s = 1.0 / jnp.sqrt(feature_size)
    clusters = jnp.stack([                                  # (2, D, K): [before, after]
        s * jax.random.normal(k0, (D, K), jnp.float32),
        s * jax.random.normal(k2, (D, K), jnp.float32)], axis=0)
    clusters2 = jnp.stack([                                 # (2, K, D): pre-transposed
        (s * jax.random.normal(k1, (D, K), jnp.float32)).T,
        (s * jax.random.normal(k3, (D, K), jnp.float32)).T], axis=0)

    fan_in = feature_size * vocab_size                      # = 2 * K * D
    bound = 1.0 / jnp.sqrt(fan_in)
    C = num_classes + 1
    # fc weight stored lane-dense as (C, F_in) with columns ordered
    # (branch, k, d).  NOTE: when importing a torch checkpoint, permute:
    #   fc_w[:, s*K*D + k*D + d] = torch_fc_weight[:, s*K*D + d*K + k]
    fc_w = jax.random.uniform(k4, (C, fan_in), jnp.float32, -bound, bound)
    fc_b = jax.random.uniform(k5, (1, C), jnp.float32, -bound, bound)
    return {"clusters": clusters, "clusters2": clusters2,
            "fc_w": fc_w, "fc_b": fc_b}


@jax.jit
def model_forward(inputs, params):
    # inputs: (B, T, D) with D == model feature size (== 512 in torch defaults).
    # TODO(synk): feature_extractor Linear path (only active when last dim != 512)
    # is not exercised here; inputs already match the model feature size.
    B, T, D = inputs.shape
    N = T // 2
    # view frames as (B, 2, N, D): [:, 0] = first half (before), [:, 1] = second half (after)
    x = inputs.reshape(B, 2, N, D)
    pooled = netvlad_fused(x, params["clusters"], params["clusters2"])  # (B, 2, K, D)
    pooled = pooled.reshape(B, -1)
    # Dropout(p=0.4) is identity at inference time.
    return fc_sigmoid(pooled, params["fc_w"], params["fc_b"])


if __name__ == "__main__":
    # Small shapes consistent with the module:
    #   batch=2, window_size_frame=8 frames, feature_size=32, vocab_size=8
    #   -> cluster_size=4 per NetVLAD, fc in = 32*8 = 256, num_classes=5 -> 6 outputs
    B, T, D = 2, 8, 32
    VOCAB, NUM_CLASSES = 8, 5

    key = jax.random.PRNGKey(0)
    k_in, k_par = jax.random.split(key)
    inputs = jax.random.normal(k_in, (B, T, D), jnp.float32)
    params = init_params(k_par, D, VOCAB, NUM_CLASSES)

    out = model_forward(inputs, params)
    out = jax.block_until_ready(out)
    assert out.shape == (B, NUM_CLASSES + 1), out.shape
    assert bool(jnp.all(jnp.isfinite(out)))
    assert bool(jnp.all((out >= 0.0) & (out <= 1.0)))
    print("KERNEL_OK")
</pallas_src>

<mosaic_0001>
module attributes {stable_mosaic.version = 11 : i64} {
  func.func @netvlad_kernel(%arg0: i32, %arg1: i32, %arg2: memref<2x1x4x32xf32, #tpu.memory_space<vmem>>, %arg3: memref<1x32x4xbf16, #tpu.memory_space<vmem>>, %arg4: memref<1x4x32xf32, #tpu.memory_space<vmem>>, %arg5: memref<2x1x4x32xf32, #tpu.memory_space<vmem>>) attributes {dimension_semantics = [#tpu.dimension_semantics<parallel>, #tpu.dimension_semantics<parallel>], iteration_bounds = array<i64: 2, 1>, scalar_prefetch = 0 : i64, scratch_operands = 0 : i64, tpu.core_type = #tpu.core_type<tc>, window_params = [{transform_indices = @transform_0, window_bounds = array<i64: 2, 1, 4, 32>}, {transform_indices = @transform_1, window_bounds = array<i64: 1, 32, 4>}, {transform_indices = @transform_2, window_bounds = array<i64: 1, 4, 32>}, {transform_indices = @transform_3, window_bounds = array<i64: 2, 1, 4, 32>}]} {
    %c0 = arith.constant 0 : index
    %c0_0 = arith.constant 0 : index
    %c0_1 = arith.constant 0 : index
    %c0_2 = arith.constant 0 : index
    %0 = vector.load %arg2[%c0, %c0_0, %c0_1, %c0_2] : memref<2x1x4x32xf32, #tpu.memory_space<vmem>>, vector<2x1x4x32xf32>
    %1 = vector.shape_cast %0 : vector<2x1x4x32xf32> to vector<2x4x32xf32>
    %2 = arith.mulf %1, %1 : vector<2x4x32xf32>
    %cst = arith.constant dense<0.000000e+00> : vector<2x4xf32>
    %3 = vector.multi_reduction <add>, %2, %cst [2] : vector<2x4x32xf32> to vector<2x4xf32>
    %4 = vector.shape_cast %3 : vector<2x4xf32> to vector<2x4x1xf32>
    %cst_3 = arith.constant 1.000000e-24 : f32
    %5 = vector.broadcast %cst_3 : f32 to vector<2x4x1xf32>
    %6 = arith.maximumf %4, %5 : vector<2x4x1xf32>
    %7 = math.rsqrt %6 : vector<2x4x1xf32>
    %8 = vector.broadcast %7 : vector<2x4x1xf32> to vector<2x4x32xf32>
    %9 = arith.mulf %1, %8 : vector<2x4x32xf32>
    %10 = arith.truncf %9 : vector<2x4x32xf32> to vector<2x4x32xbf16>
    %11 = vector.shape_cast %10 : vector<2x4x32xbf16> to vector<8x32xbf16>
    %c0_4 = arith.constant 0 : index
    %c0_5 = arith.constant 0 : index
    %c0_6 = arith.constant 0 : index
    %12 = vector.load %arg3[%c0_4, %c0_5, %c0_6] : memref<1x32x4xbf16, #tpu.memory_space<vmem>>, vector<1x32x4xbf16>
    %13 = vector.shape_cast %12 : vector<1x32x4xbf16> to vector<32x4xbf16>
    %cst_7 = arith.constant dense<0.000000e+00> : vector<8x4xf32>
    %14 = tpu.matmul %11, %13, %cst_7 {dimension_numbers = #tpu.dot_dimension_numbers<[1], [0], [0], [1], [0, 0, 1, 1], [], []>} : vector<8x32xbf16>, vector<32x4xbf16>, vector<8x4xf32> -> vector<8x4xf32>
    %cst_8 = arith.constant dense<0xFF800000> : vector<8xf32>
    %15 = vector.multi_reduction <maximumf>, %14, %cst_8 [1] : vector<8x4xf32> to vector<8xf32>
    %16 = vector.shape_cast %15 : vector<8xf32> to vector<8x1xf32>
    %17 = vector.broadcast %16 : vector<8x1xf32> to vector<8x4xf32>
    %18 = arith.subf %14, %17 : vector<8x4xf32>
    %19 = math.exp %18 : vector<8x4xf32>
    %cst_9 = arith.constant dense<0.000000e+00> : vector<8xf32>
    %20 = vector.multi_reduction <add>, %19, %cst_9 [1] : vector<8x4xf32> to vector<8xf32>
    %21 = vector.shape_cast %20 : vector<8xf32> to vector<8x1xf32>
    %22 = tpu.reciprocal %21 {approx = true} : vector<8x1xf32> -> vector<8x1xf32>
    %23 = vector.broadcast %22 : vector<8x1xf32> to vector<8x4xf32>
    %24 = arith.mulf %19, %23 : vector<8x4xf32>
    %25 = vector.shape_cast %24 : vector<8x4xf32> to vector<2x4x4xf32>
    %cst_10 = arith.constant dense<0.000000e+00> : vector<2x4xf32>
    %26 = vector.multi_reduction <add>, %25, %cst_10 [1] : vector<2x4x4xf32> to vector<2x4xf32>
    %27 = vector.shape_cast %26 : vector<2x4xf32> to vector<2x4x1xf32>
    %c0_11 = arith.constant 0 : index
    %c0_12 = arith.constant 0 : index
    %c0_13 = arith.constant 0 : index
    %28 = vector.load %arg4[%c0_11, %c0_12, %c0_13] : memref<1x4x32xf32, #tpu.memory_space<vmem>>, vector<1x4x32xf32>
    %29 = vector.shape_cast %28 : vector<1x4x32xf32> to vector<4x32xf32>
    %30 = vector.shape_cast %29 : vector<4x32xf32> to vector<1x4x32xf32>
    %31 = vector.broadcast %27 : vector<2x4x1xf32> to vector<2x4x32xf32>
    %32 = vector.broadcast %30 : vector<1x4x32xf32> to vector<2x4x32xf32>
    %33 = arith.mulf %31, %32 : vector<2x4x32xf32>
    %34 = arith.truncf %25 : vector<2x4x4xf32> to vector<2x4x4xbf16>
    "tpu.trace_start"() <{level = 10 : i32, message = "bnk,bnd->bkd"}> : () -> ()
    %cst_14 = arith.constant dense<0.000000e+00> : vector<2x4x32xf32>
    %35 = tpu.matmul %34, %10, %cst_14 {dimension_numbers = #tpu.dot_dimension_numbers<[1], [1], [2], [2], [0, 0, 0, 2, 1, 2], [0], [0]>} : vector<2x4x4xbf16>, vector<2x4x32xbf16>, vector<2x4x32xf32> -> vector<2x4x32xf32>
    "tpu.trace_stop"() : () -> ()
    %36 = arith.subf %35, %33 : vector<2x4x32xf32>
    %37 = arith.mulf %36, %36 : vector<2x4x32xf32>
    %cst_15 = arith.constant dense<0.000000e+00> : vector<2x4xf32>
    %38 = vector.multi_reduction <add>, %37, %cst_15 [2] : vector<2x4x32xf32> to vector<2x4xf32>
    %39 = vector.shape_cast %38 : vector<2x4xf32> to vector<2x4x1xf32>
    %cst_16 = arith.constant 1.000000e-24 : f32
    %40 = vector.broadcast %cst_16 : f32 to vector<2x4x1xf32>
    %41 = arith.maximumf %39, %40 : vector<2x4x1xf32>
    %42 = math.rsqrt %41 : vector<2x4x1xf32>
    %43 = arith.mulf %42, %42 : vector<2x4x1xf32>
    %44 = arith.mulf %39, %43 : vector<2x4x1xf32>
    %cst_17 = arith.constant dense<0.000000e+00> : vector<2x1xf32>
    %45 = vector.multi_reduction <add>, %44, %cst_17 [1] : vector<2x4x1xf32> to vector<2x1xf32>
    %46 = vector.shape_cast %45 : vector<2x1xf32> to vector<2x1x1xf32>
    %cst_18 = arith.constant 1.000000e-24 : f32
    %47 = vector.broadcast %cst_18 : f32 to vector<2x1x1xf32>
    %48 = arith.maximumf %46, %47 : vector<2x1x1xf32>
    %49 = math.rsqrt %48 : vector<2x1x1xf32>
    %50 = vector.broadcast %49 : vector<2x1x1xf32> to vector<2x4x1xf32>
    %51 = arith.mulf %42, %50 : vector<2x4x1xf32>
    %52 = vector.broadcast %51 : vector<2x4x1xf32> to vector<2x4x32xf32>
    %53 = arith.mulf %36, %52 : vector<2x4x32xf32>
    %54 = vector.shape_cast %53 : vector<2x4x32xf32> to vector<2x1x4x32xf32>
    %c0_19 = arith.constant 0 : index
    %c0_20 = arith.constant 0 : index
    %c0_21 = arith.constant 0 : index
    %c0_22 = arith.constant 0 : index
    %55 = vector.load %arg5[%c0_19, %c0_20, %c0_21, %c0_22] : memref<2x1x4x32xf32, #tpu.memory_space<vmem>>, vector<2x1x4x32xf32>
    tpu.vector_store %arg5[%c0_19, %c0_20, %c0_21, %c0_22], %54 {strides = array<i32>} : memref<2x1x4x32xf32, #tpu.memory_space<vmem>>, vector<2x1x4x32xf32>,
    return
  }
  func.func @transform_0(%arg0: i32, %arg1: i32) -> (i32, i32, i32, i32) {
    %c0_i32 = arith.constant 0 : i32
    %c0_i32_0 = arith.constant 0 : i32
    %c0_i32_1 = arith.constant 0 : i32
    return %arg1, %arg0, %c0_i32, %c0_i32_0 : i32, i32, i32, i32
  }
  func.func @transform_1(%arg0: i32, %arg1: i32) -> (i32, i32, i32) {
    %c0_i32 = arith.constant 0 : i32
    %c0_i32_0 = arith.constant 0 : i32
    %c0_i32_1 = arith.constant 0 : i32
    return %arg0, %c0_i32, %c0_i32_0 : i32, i32, i32
  }
  func.func @transform_2(%arg0: i32, %arg1: i32) -> (i32, i32, i32) {
    %c0_i32 = arith.constant 0 : i32
    %c0_i32_0 = arith.constant 0 : i32
    %c0_i32_1 = arith.constant 0 : i32
    return %arg0, %c0_i32, %c0_i32_0 : i32, i32, i32
  }
  func.func @transform_3(%arg0: i32, %arg1: i32) -> (i32, i32, i32, i32) {
    %c0_i32 = arith.constant 0 : i32
    %c0_i32_0 = arith.constant 0 : i32
    %c0_i32_1 = arith.constant 0 : i32
    return %arg1, %arg0, %c0_i32, %c0_i32_0 : i32, i32, i32, i32
  }
}

module attributes {stable_mosaic.version = 11 : i64} {
  func.func @fc_sigmoid_kernel(%arg0: i32, %arg1: memref<2x256xf32, #tpu.memory_space<vmem>>, %arg2: memref<6x256xbf16, #tpu.memory_space<vmem>>, %arg3: memref<1x6xf32, #tpu.memory_space<vmem>>, %arg4: memref<2x6xf32, #tpu.memory_space<vmem>>, %arg5: memref<2x6xf32, #tpu.memory_space<vmem>>) attributes {dimension_semantics = [#tpu.dimension_semantics<arbitrary>], iteration_bounds = array<i64: 1>, scalar_prefetch = 0 : i64, scratch_operands = 1 : i64, tpu.core_type = #tpu.core_type<tc>, window_params = [{transform_indices = @transform_0, window_bounds = array<i64: 2, 256>}, {transform_indices = @transform_1, window_bounds = array<i64: 6, 256>}, {pipeline_mode = #tpu.pipeline_mode<synchronous>, transform_indices = @transform_2, window_bounds = array<i64: 1, 6>}, {pipeline_mode = #tpu.pipeline_mode<synchronous>, transform_indices = @transform_3, window_bounds = array<i64: 2, 6>}]} {
    %c0_i32 = arith.constant 0 : i32
    %0 = arith.cmpi eq, %arg0, %c0_i32 : i32
    %1 = arith.extui %0 : i1 to i32
    %c0_i32_0 = arith.constant 0 : i32
    %2 = arith.cmpi ne, %1, %c0_i32_0 : i32
    scf.if %2 {
      %cst_10 = arith.constant 0.000000e+00 : f32
      %13 = vector.broadcast %cst_10 : f32 to vector<2x6xf32>
      %c0_11 = arith.constant 0 : index
      %c0_12 = arith.constant 0 : index
      %14 = vector.load %arg5[%c0_11, %c0_12] : memref<2x6xf32, #tpu.memory_space<vmem>>, vector<2x6xf32>
      tpu.vector_store %arg5[%c0_11, %c0_12], %13 {strides = array<i32>} : memref<2x6xf32, #tpu.memory_space<vmem>>, vector<2x6xf32>,
    } else {
    }
    %c0 = arith.constant 0 : index
    %c0_1 = arith.constant 0 : index
    %3 = vector.load %arg5[%c0, %c0_1] : memref<2x6xf32, #tpu.memory_space<vmem>>, vector<2x6xf32>
    %c0_2 = arith.constant 0 : index
    %c0_3 = arith.constant 0 : index
    %4 = vector.load %arg1[%c0_2, %c0_3] : memref<2x256xf32, #tpu.memory_space<vmem>>, vector<2x256xf32>
    %5 = arith.truncf %4 : vector<2x256xf32> to vector<2x256xbf16>
    %c0_4 = arith.constant 0 : index
    %c0_5 = arith.constant 0 : index
    %6 = vector.load %arg2[%c0_4, %c0_5] : memref<6x256xbf16, #tpu.memory_space<vmem>>, vector<6x256xbf16>
    %cst = arith.constant dense<0.000000e+00> : vector<2x6xf32>
    %7 = tpu.matmul %5, %6, %cst {dimension_numbers = #tpu.dot_dimension_numbers<[1], [1], [0], [0], [0, 0, 1, 0], [], []>} : vector<2x256xbf16>, vector<6x256xbf16>, vector<2x6xf32> -> vector<2x6xf32>
    %8 = arith.addf %3, %7 : vector<2x6xf32>
    %c0_6 = arith.constant 0 : index
    %c0_7 = arith.constant 0 : index
    %9 = vector.load %arg5[%c0_6, %c0_7] : memref<2x6xf32, #tpu.memory_space<vmem>>, vector<2x6xf32>
    tpu.vector_store %arg5[%c0_6, %c0_7], %8 {strides = array<i32>} : memref<2x6xf32, #tpu.memory_space<vmem>>, vector<2x6xf32>,
    %c0_i32_8 = arith.constant 0 : i32
    %10 = arith.cmpi eq, %arg0, %c0_i32_8 : i32
    %11 = arith.extui %10 : i1 to i32
    %c0_i32_9 = arith.constant 0 : i32
    %12 = arith.cmpi ne, %11, %c0_i32_9 : i32
    scf.if %12 {
      %c0_10 = arith.constant 0 : index
      %c0_11 = arith.constant 0 : index
      %13 = vector.load %arg5[%c0_10, %c0_11] : memref<2x6xf32, #tpu.memory_space<vmem>>, vector<2x6xf32>
      %c0_12 = arith.constant 0 : index
      %c0_13 = arith.constant 0 : index
      %14 = vector.load %arg3[%c0_12, %c0_13] : memref<1x6xf32, #tpu.memory_space<vmem>>, vector<1x6xf32>
      %15 = vector.broadcast %14 : vector<1x6xf32> to vector<2x6xf32>
      %16 = arith.addf %13, %15 : vector<2x6xf32>
      %17 = arith.negf %16 : vector<2x6xf32>
      %18 = math.exp %17 : vector<2x6xf32>
      %cst_14 = arith.constant 1.000000e+00 : f32
      %19 = vector.broadcast %cst_14 : f32 to vector<2x6xf32>
      %20 = arith.addf %19, %18 : vector<2x6xf32>
      %21 = arith.divf %19, %20 : vector<2x6xf32>
      %c0_15 = arith.constant 0 : index
      %c0_16 = arith.constant 0 : index
      %22 = vector.load %arg4[%c0_15, %c0_16] : memref<2x6xf32, #tpu.memory_space<vmem>>, vector<2x6xf32>
      tpu.vector_store %arg4[%c0_15, %c0_16], %21 {strides = array<i32>} : memref<2x6xf32, #tpu.memory_space<vmem>>, vector<2x6xf32>,
    } else {
    }
    return
  }
  func.func @transform_0(%arg0: i32) -> (i32, i32) {
    %c0_i32 = arith.constant 0 : i32
    %c0_i32_0 = arith.constant 0 : i32
    return %c0_i32, %arg0 : i32, i32
  }
  func.func @transform_1(%arg0: i32) -> (i32, i32) {
    %c0_i32 = arith.constant 0 : i32
    %c0_i32_0 = arith.constant 0 : i32
    return %c0_i32, %arg0 : i32, i32
  }
  func.func @transform_2(%arg0: i32) -> (i32, i32) {
    %c0_i32 = arith.constant 0 : i32
    %c0_i32_0 = arith.constant 0 : i32
    %c0_i32_1 = arith.constant 0 : i32
    return %c0_i32, %c0_i32_0 : i32, i32
  }
  func.func @transform_3(%arg0: i32) -> (i32, i32) {
    %c0_i32 = arith.constant 0 : i32
    %c0_i32_0 = arith.constant 0 : i32
    %c0_i32_1 = arith.constant 0 : i32
    return %c0_i32, %c0_i32_0 : i32, i32
  }
}

</mosaic_0001>

<bundles_post_ra>
// kernel: model_forward.3
= control target key start
LH: loop header
LB: loop body
LE: loop exit
PB: predicated region body
PF: predicated region fallthrough
CT: control target
= control target key end

     0   :  { %s204_s0 = inlined_call_operand.vmem [shape: f32[2,256], index: 0, kind: input, shape index: {}]   ;;  %s205_s1 = inlined_call_operand.vmem [shape: bf16[6,256], index: 1, kind: input, shape index: {}]   ;;  %s206_s2 = inlined_call_operand.vmem [shape: f32[1,6], index: 2, kind: input, shape index: {}]   ;;  %s207_s3 = inlined_call_operand.hbm [shape: f32[2,6], index: 3, kind: output, shape index: {}]  }
   0x1   :  { %v37_v0 = vld [vmem:[%s205_s1] sm:$0x77] }
   0x2   :  { %v121_v1 = vld.sshfl [vmem:[%s204_s0] sm:$0x33 pattern:$0x76325410]  ;;  %v123_v2 = vcombine.high %v37_v0, %v37_v0  ;;  %v122_v3 = vcombine.low %v37_v0, %v37_v0 }
   0x3   :  { %v32_v4 = vcombine.high %v121_v1, %v121_v1 }
   0x4   :  { %8 = vsyncpa [#allocation4], 0  ;;  %vm20_vm0 = vcmask 41984   ;;  %45 = vmatprep.subr.bf16.mxu0 %v123_v2  ;;  %v158_v6 = vmov 0.0   ;;  %v35_v7 = vpack.c.bf16 %v121_v1, %v121_v1  ;;  %v124_v14 = vld [vmem:[%s206_s2] ss:$0 sm:$0xff] }
   0x5   :  { %v36_v5 = vpack.c.bf16 %v32_v4, %v32_v4  ;;  %21 = vst.msk [vmem:[#allocation2] sm:$0x3] %vm20_vm0, %v158_v6  ;;  %46 = vmatpush1.bf16.xpose.msra.mxu0 %v122_v3  ;;  %s159_s16 = smov [#allocation3]  }
   0x6   :  { %s113_s17 = sshll.u32 %s159_s16, 4  ;;  %s114_s17 = int_to_ptr.vmem [resolvable:$true] %s113_s17 }
   0x7   :  { %77 = vmatprep.mubr.bf16.mxu0 %v36_v5  ;;  %s134_s18 = scalar_lea.vmem %s114_s17, 32  ;;  %p139_p1 = scmp.lt.s32.totalorder %s114_s17, %s114_s17 }
   0x8   :  { %p135_p0 = scmp.ne.s32.totalorder %s114_s17, %s134_s18  ;;  %p140_p2 = scmp.lt.s32.totalorder %s134_s18, %s134_s18 }
   0xa   :  { %p141_p3 = por %p140_p2, %p139_p1 }
   0xc   :  { %78 = vmatmul.mubr.bf16.vlgmr.msra.gmra.mrb[0].mxu0 %v35_v7  ;;  %v22_v8 = vld [vmem:[#allocation2] sm:$0x3]  ;;  %p142_p4 = pnand %p141_p3, %p135_p0 }
  0xdf   :  { %v79_v9 = vpop.f32.mrb[0].mxu0 }
  0xe0   :  { %v85_v10 = vadd.f32 %v79_v9, %v22_v8  ;;  %v81_v11 = vpop.f32.mrb[1].mxu0 }
  0xe1   :  { %v82_v12 = vpop.f32.mrb[2].mxu0 }
  0xe2   :  { %87 = vst.msk [vmem:[#allocation2] sm:$0x3] %vm20_vm0, %v85_v10  ;;  %v83_v13 = vpop.f32.mrb[3].mxu0 }
  0xe9   :  { %v91_v15 = vld [vmem:[#allocation2] sm:$0x3] }
  0xea   :  { %v99_v16 = vadd.f32 %v124_v14, %v91_v15 }
  0xec   :  { %v125_v17 = vmul.f32 -1.442695, %v99_v16 }
  0xee   :  { %130 = vpow2.f32 %v125_v17 }
  0xf8   :  { %v131_v18 = vpop.eup %130 }
  0xf9   :  { %v103_v19 = vadd.f32 1.0, %v131_v18 }
  0xfb   :  { %132 = vrcp.f32 %v103_v19 }
 0x105   :  { %v133_v20 = vpop.eup %132 }
 0x106   :  { %106 = vst.msk [vmem:[#allocation3] sm:$0x3] %vm20_vm0, %v133_v20 }
 0x107   :  { %145 = shalt.err (!%p142_p4)
}
 0x108   :  { %s146_s20 = scalar_lea.hbm %s207_s3, 32 }
 0x109   :  { %p147_p5 = scmp.ne.s32.totalorder %s207_s3, %s146_s20  ;;  %p150_p6 = scmp.lt.u32.totalorder %s146_s20, %s207_s3 }
 0x10b   :  { %p152_p7 = pnand %p150_p6, %p147_p5 }
 0x10d   :  { %155 = shalt.err (!%p152_p7)
}
 0x10e   :  { %116 = dma.vmem_to_hbm [thread:$0]  %s114_s17, 32, %s207_s3, [#allocation4]  }
 0x10f   :  { %156 = dma.done.wait [#allocation4], 32  }
 0x110   :  { %157 = vsyncadd [#allocation4], 4294967264 }
 0x111   :  { %120 = vsyncpa [#allocation4], 1 }

// kernel: model_forward.2
= control target key start
LH: loop header
LB: loop body
LE: loop exit
PB: predicated region body
PF: predicated region fallthrough
CT: control target
= control target key end

     0   :  { %s890_s12 = smov 0   ;;  %s892_s13 = smov 0   ;;  %s998_s0 = inlined_call_operand.vmem [shape: f32[2,2,4,32], index: 0, kind: input, shape index: {}]   ;;  %s999_s1 = inlined_call_operand.vmem [shape: bf16[2,32,4], index: 1, kind: input, shape index: {}]   ;;  %s1000_s2 = inlined_call_operand.vmem [shape: f32[2,4,32], index: 2, kind: input, shape index: {}]   ;;  %s1001_s3 = inlined_call_operand.vmem [shape: f32[2,2,4,32], index: 3, kind: output, shape index: {}]  }
   0x1   :  { %s894_s14 = smov 0   ;;  %s896_s15 = smov 0  }
   0x2   :  { %s898_s16 = smov 0  }
   0x3 LB: > { %s25_s17 = sadd.s32 1, %s861_s15  ;;  %s715_s18 = sadd.s32 4294967295, %s865_s16   ;;  %s865_s16 = sphi %s898_s16, %s13_s16   ;;  %s861_s15 = sphi %s896_s15, %s1006_s15   ;;  %s857_s14 = sphi %s894_s14, %s1005_s14   ;;  %s853_s13 = sphi %s892_s13, %s1004_s13   ;;  %s849_s12 = sphi %s890_s12, %s1003_s12  }
   0x4   : > { %p27_p0 = scmp.ge.s32.totalorder %s25_s17, 2  ;;  %p41_p1 = scmp.ne.s32.totalorder %s853_s13, %s849_s12 }
   0x5   : > { %p42_p2 = scmp.eq.s32.totalorder %s865_s16, 0  ;;  %p125_p4 = scmp.eq.s32.totalorder %s715_s18, 1 }
   0x6   : > { %s1008_s17 = smov (%p27_p0, %s25_s17), 0  ;;  %s34_s20 = sadd.s32 1, %s853_s13 }
   0x7   : > { %p43_p3 = por %p42_p2, %p41_p1  ;;  %s30_s19 = ssub.s32 %s861_s15, %s1008_s17 }
   0x8   : > { %p32_p5 = scmp.eq.s32.totalorder %s30_s19, 0  ;;  %p925_p6 = por %p125_p4, %p41_p1 }
   0x9   : > { %p718_p7 = scmp.ge.s32.totalorder %s865_s16, 2 }
   0xa   : > { %s930_s22 = scalar_select %p32_p5, %s853_s13, %s34_s20  }
   0xb   : > { %147 = sbr.rel (%p718_p7) target bundleno = 25 (0x19), region = 16 }
  0x12   : > { %150 = sbr.rel (!%p43_p3) target bundleno = 25 (0x19), region = 20  ;;  %s152_s23 = sand.u32 (%p43_p3), 1, %s853_s13  }
  0x13   : > { %s720_s24 = sshll.u32 (%p43_p3), %s861_s15, 2  ;;  %s719_s25 = sshll.u32 (%p43_p3), %s152_s23, 3 }
  0x14   : > { %s159_s28 = scalar_lea.vmem (%p43_p3), %s998_s0, %s720_s24  ;;  %s154_s29 = scalar_lea.vmem (%p43_p3), [#allocation2], %s719_s25 }
  0x15   : > { %v175_v0 = vld [vmem:[%s159_s28] sm:$0xf] (%p43_p3)  ;;  %v177_v1 = vld [vmem:[%s159_s28 + $0x8] sm:$0xf] (%p43_p3) }
  0x16   : > { %176 = vst [vmem:[%s154_s29] sm:$0xf] (%p43_p3), %v175_v0  ;;  %178 = vst [vmem:[%s154_s29 + $0x4] sm:$0xf] (%p43_p3), %v177_v1 }
  0x19 PF: > { %p721_p8 = scmp.ge.s32.totalorder %s865_s16, 1  ;;  %p219_p9 = scmp.lt.s32.totalorder %s865_s16, 3 }
  0x1b   : > { %p220_p10 = pnand %p721_p8, %p219_p9 }
  0x1c   : > { %s226_s30 = sand.u32 (!%p220_p10), 1, %s849_s12   ;;  %vm273_vm0 = vcmask (!%p220_p10), 257024   ;;  %p258_p11 = scmp.lt.s32.totalorder (!%p220_p10), %s857_s14, 1  ;;  %v867_v8 = vmov (!%p220_p10), 0.0   ;;  %vm868_vm1 = vmmov (!%p220_p10), 0   ;;  %v298_v17 = vlaneseq (!%p220_p10) }
  0x1d   : > { %223 = sbr.rel (%p220_p10) target bundleno = 1254 (0x4e6), region = 69  ;;  %s941_s4 = sshll.u32 (!%p220_p10), %s226_s30, 3  ;;  %745 = vmatprep.subr.bf16.mxu0 (!%p220_p10), %v867_v8  ;;  %753 = vmatprep.subr.bf16.mxu1 (!%p220_p10), %v867_v8  ;;  %v869_v15 = vmov (!%p220_p10), 1983009808   ;;  %vm418_vm2 = vcmask (!%p220_p10), 1041408   ;;  %vm314_vm3 = vcmask (!%p220_p10), 261120  }
  0x1e   : > { %s228_s5 = scalar_lea.vmem (!%p220_p10), [#allocation2], %s941_s4  ;;  %749 = vmatprep.mubr.msk.bf16.mxu0 (!%p220_p10), %vm868_vm1, %v867_v8  ;;  %755 = vmatprep.mubr.msk.bf16.mxu1 (!%p220_p10), %vm868_vm1, %v867_v8  ;;  %v296_v16 = vunpack.c.l.s4 (!%p220_p10), %v869_v15  ;;  %v299_v21 = vshrl.u32 (!%p220_p10), %v298_v17, 7  ;;  %vm358_vm4 = vcmask (!%p220_p10), 31744   ;;  %vm373_vm5 = vcmask (!%p220_p10), 27648   ;;  %s256_s20 = scalar_lea.vmem (!%p220_p10), [#allocation3], %s941_s4 }
  0x1f   : > { %v269_v2 = vld [vmem:[%s228_s5] sm:$0xf] (!%p220_p10)  ;;  %v270_v3 = vld [vmem:[%s228_s5 + $0x4] sm:$0xf] (!%p220_p10)  ;;  %vm542_vm6 = vcmask (!%p220_p10), 1043456  }
  0x20   : > { %v271_v4 = vmul.f32 (!%p220_p10), %v269_v2, %v269_v2  ;;  %v272_v5 = vmul.f32 (!%p220_p10), %v270_v3, %v270_v3  ;;  %v297_v20 = vunpack.c.0.s8 (!%p220_p10), %v296_v16 }
  0x22   : > { %v274_v6 = vsel (!%p220_p10), %vm273_vm0, %v271_v4, 0.0  ;;  %v277_v7 = vsel (!%p220_p10), %vm273_vm0, %v272_v5, 0.0  ;;  %v300_v26 = vsub.s32 (!%p220_p10), %v297_v20, %v299_v21 }
  0x23   : > { %275 = vadd.xlane.f32.xlu0 (!%p220_p10), %v274_v6 }
  0x24   : > { %s950_s6 = scalar_select %p258_p11, %s857_s14, 1 }
  0x25   : > { %s734_s23 = sshll.u32 (%p925_p6), %s857_s14, 2 }
  0x26   : > { %s737_s7 = sshll.u32 %s950_s6, 4  ;;  %s726_s11 = sshll.u32 %s950_s6, 2 }
  0x27   : > { %278 = vadd.xlane.f32.xlu0 %v277_v7  ;;  %s262_s10 = scalar_lea.vmem %s999_s1, %s737_s7  ;;  %s266_s19 = scalar_lea.vmem %s1000_s2, %s726_s11 }
  0x28   : > { %v809_v9 = vld [vmem:[%s262_s10] sm:$0xff]   ;;  %v810_v10 = vld [vmem:[%s262_s10 + $0x8] sm:$0xff]   ;;  %s578_s26 = scalar_lea.vmem (%p925_p6), %s1001_s3, %s734_s23 }
  0x29   : > { %746 = vmatpush3.bf16.msra.mxu0 %v809_v9  ;;  %v394_v63 = vld [vmem:[%s266_s19] sm:$0xf] }
  0x2a   : > { %747 = vmatprep.subr.bf16.mxu0 %v867_v8 }
  0x2d   : > { %748 = vmatpush3.bf16.msra.mxu0 %v810_v10 }
  0xb0   : > { %v276_v11 = vpop.xlane.xlu0 %275 }
  0xb1   : > { %v280_v12 = vmax.f32 %v276_v11, 1e-24 }
  0xb3   : > { %811 = vrsqrt.f32 %v280_v12 }
  0xb4   : > { %v279_v13 = vpop.xlane.xlu0 %278 }
  0xb5   : > { %v281_v14 = vmax.f32 %v279_v13, 1e-24 }
  0xb7   : > { %813 = vrsqrt.f32 %v281_v14 }
  0xbd   : > { %v812_v18 = vpop.eup %811 }
  0xbe   : > { %v284_v19 = vmul.f32 %v812_v18, %v269_v2 }
  0xc0   : > { %v286_v22 = vpack.c.bf16 %v284_v19, %v284_v19 }
  0xc1   : > { %v814_v23 = vpop.eup %813 }
  0xc2   : > { %v285_v24 = vmul.f32 %v814_v23, %v270_v3  ;;  %v420_v25 = vsel %vm418_vm2, %v286_v22, 0 }
  0xc3   : > { %754 = vmatpush3.bf16.msra.mxu1 %v420_v25 }
  0xc4   : > { %v287_v27 = vpack.c.bf16 %v285_v24, %v285_v24  ;;  %v727_v28 = vpack.c.bf16 %v285_v24, %v284_v19  ;;  %759 = vmatprep.subr.bf16.mxu1 %v867_v8 }
  0xc6   : > { %v482_v29 = vsel %vm418_vm2, %v287_v27, 0  ;;  %v301_v30 = vrot.slane %v727_v28, %v300_v26 }
  0xc8   : > { %750 = vmatmul.mubr.msk.bf16.vlgmr.msra.gmra.mrb[0].mxu0 %vm314_vm3, %v301_v30 }
 0x19b   : > { %v352_v31 = vpop.f32.mrb[0].mxu0 }
 0x19c   : > { %v751_v32 = vpop.f32.mrb[1].mxu0  ;;  %v359_v33 = vsel %vm358_vm4, %v352_v31, -inf }
 0x19d   : > { %360 = vmax.xlane.f32.xlu1 %v359_v33  ;;  %v355_v34 = vpop.f32.mrb[2].mxu0 }
 0x19e   : > { %v752_v35 = vpop.f32.mrb[3].mxu0 }
 0x22a   : > { %v361_v36 = vpop.xlane.xlu1 %360 }
 0x22b   : > { %v362_v37 = vsub.f32 %v352_v31, %v361_v36 }
 0x22d   : > { %v363_v38 = vmul.f32 1.442695, %v362_v37 }
 0x22f   : > { %815 = vpow2.f32 %v363_v38 }
 0x239   : > { %v816_v39 = vpop.eup %815 }
 0x23a   : > { %v365_v40 = vsel %vm358_vm4, %v816_v39, 0.0 }
 0x23b   : > { %366 = vadd.xlane.f32.xlu1 %v365_v40 }
 0x2c8   : > { %v367_v41 = vpop.xlane.xlu1 %366 }
 0x2c9   : > { %817 = vrcp.f32 %v367_v41 }
 0x2d3   : > { %v818_v42 = vpop.eup %817 }
 0x2d4   : > { %v369_v43 = vmul.f32 %v818_v42, %v816_v39 }
 0x2d6   : > { %v397_v44 = vpack.c.bf16 %v369_v43, %v369_v43  ;;  %v371_v45 = vcombine.high %v369_v43, %v369_v43  ;;  %v374_v46 = vsel %vm373_vm5, %v369_v43, 0.0 }
 0x2d7   : > { %v375_v47 = vrot.slane %v374_v46, 4 }
 0x2d8   : > { %399 = vxpose.xlu0.c.b16.start.end [1/1] (short) (narrow) %v397_v44, 16  ;;  %v398_v48 = vpack.c.bf16 %v371_v45, %v371_v45  ;;  %v381_v49 = vsel %vm373_vm5, %v371_v45, 0.0 }
 0x2d9   : > { %v382_v50 = vrot.slane %v381_v49, 4  ;;  %v376_v51 = vadd.f32 %v375_v47, %v374_v46 }
 0x2da   : > { %462 = vxpose.xlu1.c.b16.start.end [1/1] (short) (narrow) %v398_v48, 16 }
 0x2db   : > { %v377_v52 = vrot.slane %v376_v51, 2  ;;  %v383_v53 = vadd.f32 %v382_v50, %v381_v49 }
 0x2dd   : > { %v378_v54 = vadd.f32 %v377_v52, %v376_v51  ;;  %v384_v55 = vrot.slane %v383_v53, 2 }
 0x2df   : > { %v379_v56 = vrot.slane %v378_v54, 1  ;;  %v385_v57 = vadd.f32 %v384_v55, %v383_v53 }
 0x2e1   : > { %v380_v58 = vadd.f32 %v379_v56, %v378_v54  ;;  %v386_v59 = vrot.slane %v385_v57, 1 }
 0x2e3   : > { %389 = vbcast.lane.b32.xlu0 %v380_v58, 256  ;;  %v387_v60 = vadd.f32 %v386_v59, %v385_v57 }
 0x2e5   : > { %392 = vbcast.lane.b32.xlu1 %v387_v60, 256 }
 0x33e   : > { %v407_v61 = vpop.trf.xlu0 }
 0x33f   : > { %756 = vmatmul.mubr.msk.bf16.vlgmr.msra.gmra.mrb[0].mxu1 %vm358_vm4, %v407_v61 }
 0x340   : > { %760 = vmatpush3.bf16.msra.mxu1 %v482_v29  ;;  %761 = vmatprep.mubr.msk.bf16.mxu1 %vm868_vm1, %v867_v8  ;;  %v470_v62 = vpop.trf.xlu1 }
 0x347   : > { %762 = vmatmul.mubr.msk.bf16.vlgmr.msra.gmra.mrb[4].mxu1 %vm358_vm4, %v470_v62 }
 0x355   : > { %v390_v0 = vpop.permute.xlu0 %389 }
 0x356   : > { %v395_v1 = vmul.f32 %v394_v63, %v390_v0 }
 0x357   : > { %v393_v9 = vpop.permute.xlu1 %392 }
 0x358   : > { %v396_v10 = vmul.f32 %v394_v63, %v393_v9 }
 0x412   : > { %v456_v2 = vpop.f32.mrb[0].mxu1 }
 0x413   : > { %v524_v3 = vsub.f32 %v456_v2, %v395_v1  ;;  %v757_v4 = vpop.f32.mrb[1].mxu1 }
 0x414   : > { %v459_v5 = vpop.f32.mrb[2].mxu1 }
 0x415   : > { %v758_v6 = vpop.f32.mrb[3].mxu1  ;;  %v526_v7 = vmul.f32 %v524_v3, %v524_v3 }
 0x417   : > { %v528_v8 = vsel %vm273_vm0, %v526_v7, 0.0 }
 0x418   : > { %529 = vadd.xlane.f32.xlu1 %v528_v8 }
 0x41a   : > { %v518_v11 = vpop.f32.mrb[4].mxu1 }
 0x41b   : > { %v525_v12 = vsub.f32 %v518_v11, %v396_v10  ;;  %v763_v13 = vpop.f32.mrb[5].mxu1 }
 0x41c   : > { %v521_v14 = vpop.f32.mrb[6].mxu1 }
 0x41d   : > { %v764_v15 = vpop.f32.mrb[7].mxu1  ;;  %v527_v16 = vmul.f32 %v525_v12, %v525_v12 }
 0x41f   : > { %v531_v17 = vsel %vm273_vm0, %v527_v16, 0.0 }
 0x420   : > { %532 = vadd.xlane.f32.xlu0 %v531_v17 }
 0x4a5   : > { %v530_v18 = vpop.xlane.xlu1 %529 }
 0x4a6   : > { %v534_v19 = vmax.f32 %v530_v18, 1e-24 }
 0x4a8   : > { %819 = vrsqrt.f32 %v534_v19 }
 0x4ad   : > { %v533_v20 = vpop.xlane.xlu0 %532 }
 0x4ae   : > { %v535_v21 = vmax.f32 %v533_v20, 1e-24 }
 0x4b0   : > { %821 = vrsqrt.f32 %v535_v21 }
 0x4b2   : > { %v820_v22 = vpop.eup %819 }
 0x4b3   : > { %v538_v23 = vmul.f32 %v820_v22, %v820_v22 }
 0x4b5   : > { %v540_v24 = vmul.f32 %v538_v23, %v530_v18 }
 0x4b7   : > { %v543_v25 = vsel %vm542_vm6, %v540_v24, 0.0 }
 0x4b8   : > { %v544_v26 = vrot.slane %v543_v25, 4 }
 0x4ba   : > { %v822_v27 = vpop.eup %821  ;;  %v545_v28 = vadd.f32 %v544_v26, %v543_v25 }
 0x4bb   : > { %v539_v29 = vmul.f32 %v822_v27, %v822_v27 }
 0x4bc   : > { %v546_v30 = vrot.slane %v545_v28, 2 }
 0x4bd   : > { %v541_v31 = vmul.f32 %v539_v29, %v533_v20 }
 0x4be   : > { %v547_v32 = vadd.f32 %v546_v30, %v545_v28 }
 0x4bf   : > { %v550_v33 = vsel %vm542_vm6, %v541_v31, 0.0 }
 0x4c0   : > { %v548_v34 = vrot.slane %v547_v32, 1  ;;  %v551_v35 = vrot.slane %v550_v33, 4 }
 0x4c2   : > { %v549_v36 = vadd.f32 %v548_v34, %v547_v32  ;;  %v552_v37 = vadd.f32 %v551_v35, %v550_v33 }
 0x4c4   : > { %v557_v38 = vmax.f32 %v549_v36, 1e-24  ;;  %v553_v39 = vrot.slane %v552_v37, 2 }
 0x4c6   : > { %823 = vrsqrt.f32 %v557_v38  ;;  %v554_v40 = vadd.f32 %v553_v39, %v552_v37 }
 0x4c8   : > { %v555_v41 = vrot.slane %v554_v40, 1 }
 0x4ca   : > { %v556_v42 = vadd.f32 %v555_v41, %v554_v40 }
 0x4cc   : > { %v558_v43 = vmax.f32 %v556_v42, 1e-24 }
 0x4ce   : > { %825 = vrsqrt.f32 %v558_v43 }
 0x4d0   : > { %v824_v44 = vpop.eup %823 }
 0x4d1   : > { %v561_v45 = vmul.f32 %v824_v44, %v820_v22 }
 0x4d3   : > { %v563_v46 = vmul.f32 %v561_v45, %v524_v3 }
 0x4d5   : > { %565 = vst.msk [vmem:[%s256_s20] sm:$0xf] %vm273_vm0, %v563_v46 }
 0x4d7   : > { %573 = sbr.rel (!%p925_p6) target bundleno = 1254 (0x4e6), region = 77 }
 0x4d8   : > { %v826_v47 = vpop.eup %825 }
 0x4d9   : > { %v562_v48 = vmul.f32 %v826_v47, %v822_v27 }
 0x4db   : > { %v564_v49 = vmul.f32 %v562_v48, %v525_v12 }
 0x4dc   : > { %v594_v50 = vld [vmem:[%s256_s20] sm:$0xf] (%p925_p6) }
 0x4dd   : > { %566 = vst.msk [vmem:[%s256_s20 + $0x4] sm:$0xf] %vm273_vm0, %v564_v49  ;;  %595 = vst [vmem:[%s578_s26] sm:$0xf] (%p925_p6), %v594_v50 }
 0x4e4   : > { %v596_v51 = vld [vmem:[%s256_s20 + $0x4] sm:$0xf] }
 0x4e5   : > { %597 = vst [vmem:[%s578_s26 + $0x8] sm:$0xf] %v596_v51 }
 0x4e6 PF: > { %s13_s16 = sadd.s32 1, %s865_s16   ;;  %s1003_s12 = smov %s853_s13 }
 0x4e7   : > { %p10_p12 = scmp.ge.s32.totalorder %s13_s16, 4   ;;  %s1004_s13 = smov %s930_s22 }
 0x4e8   : > { %s1005_s14 = smov %s861_s15  ;;  %s1006_s15 = smov %s1008_s17 }
 0x4e9   :  { %12 = sbr.rel (!%p10_p12) target bundleno = 3 (0x3), region = 155 }

</bundles_post_ra>
